<compile_context>
chip_gen: v7x
topology: tpu7x:2x2x1
jax: 0.10.0
libtpu: 0.0.40
codegen_flags: <defaults>
</compile_context>

<pallas_src>
import functools

import jax
import jax.numpy as jnp
import numpy as np
from jax import lax
from jax.experimental import pallas as pl
from jax.experimental.pallas import tpu as pltpu  # noqa: F401  (TPU backend)


def _opta_kernel(xs_ref, yq_ref, out_ref, *, eps, max_iter, thresh):
    x = xs_ref[...].astype(jnp.float32)   # (P1, D) support prototypes
    y = yq_ref[...].astype(jnp.float32)   # (P2, D) query features

    p1 = x.shape[0]
    p2 = y.shape[0]

    # ---- cost matrix C[i, j] = |x_i - y_j|^2  (p = 2), built on the MXU ----
    x2 = jnp.sum(x * x, axis=-1, keepdims=True)              # (P1, 1)
    y2 = jnp.sum(y * y, axis=-1, keepdims=True)              # (P2, 1)
    xyT = lax.dot_general(                                    # (P1, P2) = x @ y.T
        x, y, dimension_numbers=(((1,), (1,)), ((), ())),
        preferred_element_type=jnp.float32)
    c = x2 + y2.T - 2.0 * xyT
    c = jnp.maximum(c, 0.0)                                   # guard tiny negatives
    c = c / jnp.max(c)                                        # cost normalization

    # eps hoisted: iterate with nc = -C/eps and scaled potentials u/eps, v/eps.
    nc = c * jnp.float32(-1.0 / eps)                          # (P1, P2)

    log_mu = jnp.float32(np.log(1.0 / p1 + 1e-8))
    log_nu = jnp.float32(np.log(1.0 / p2 + 1e-8))
    thresh_scaled = jnp.float32(thresh / eps)                 # err in scaled-u units

    def lse(m, axis):
        mx = jnp.max(m, axis=axis, keepdims=True)
        return mx + jnp.log(jnp.sum(jnp.exp(m - mx), axis=axis, keepdims=True))

    u0 = jnp.zeros((p1, 1), jnp.float32)                      # u / eps
    v0 = jnp.zeros((1, p2), jnp.float32)                      # v / eps

    def cond(carry):
        i, _, _, err = carry
        return jnp.logical_and(i < max_iter, err >= thresh_scaled)

    def body(carry):
        i, uh, vh, _ = carry
        # M_{ij}/1 = -C/eps + u/eps + v/eps
        m1 = nc + uh + vh
        uh_new = log_mu - lse(m1, axis=-1) + uh
        m2 = nc + uh_new + vh
        vh_new = log_nu - lse(m2, axis=0) + vh
        # err computed from the u-update only (matches PyTorch), in scaled units.
        err = jnp.sum(jnp.abs(uh_new - uh))
        return (i + 1, uh_new, vh_new, err)

    _, uh, vh, _ = lax.while_loop(
        cond, body, (jnp.int32(0), u0, v0, jnp.float32(jnp.inf)))

    # transport plan pi = exp(M(C, u, v)); only its row-normalized form is used.
    pi = jnp.exp(nc + uh + vh)                                # (P1, P2)
    row_sum = jnp.sum(pi, axis=1, keepdims=True)              # (P1, 1)
    plan = pi * pl.reciprocal(row_sum, approx=False)
    out_ref[...] = jnp.dot(plan, y, preferred_element_type=jnp.float32).astype(
        out_ref.dtype)


def opta_forward(z_support, z_query, *, regularization, max_iter, stopping_criterion):
    """Pallas implementation of OpTA.forward.

    Returns (z_support_transported, z_query) like the PyTorch module.
    """
    p1, d = z_support.shape
    p2, d2 = z_query.shape
    assert d == d2

    kernel = functools.partial(
        _opta_kernel,
        eps=float(regularization),
        max_iter=int(max_iter),
        thresh=float(stopping_criterion),
    )

    z_transported = pl.pallas_call(
        kernel,
        out_shape=jax.ShapeDtypeStruct((p1, d), jnp.float32),
        in_specs=[
            pl.BlockSpec((p1, d), lambda: (0, 0)),
            pl.BlockSpec((p2, d), lambda: (0, 0)),
        ],
        out_specs=pl.BlockSpec((p1, d), lambda: (0, 0)),
    )(z_support, z_query)   # no wrapper-side cast: kernel casts to f32 itself
    return z_transported, z_query


# ---------------- pure-JAX/numpy reference (mirrors the PyTorch code) ----------------
def _opta_reference(x, y, *, eps, max_iter, thresh):
    x = x.astype(jnp.float32)
    y = y.astype(jnp.float32)
    c = jnp.sum(jnp.abs(x[:, None, :] - y[None, :, :]) ** 2, axis=-1)
    c = c / jnp.max(c)
    p1, p2 = c.shape
    log_mu = jnp.log(1.0 / p1 + 1e-8)
    log_nu = jnp.log(1.0 / p2 + 1e-8)
    u = jnp.zeros((p1,), jnp.float32)
    v = jnp.zeros((p2,), jnp.float32)

    def M(u, v):
        return (-c + u[:, None] + v[None, :]) / eps

    u_np, v_np = np.array(u), np.array(v)
    for _ in range(max_iter):
        u1 = u_np
        u_np = eps * (log_mu - jax.nn.logsumexp(M(u_np, v_np), axis=-1)) + u_np
        v_np = eps * (log_nu - jax.nn.logsumexp(M(u_np, v_np).T, axis=-1)) + v_np
        u_np, v_np = np.array(u_np), np.array(v_np)
        err = float(np.sum(np.abs(u_np - u1)))
        if err < thresh:
            break
    pi = np.array(jnp.exp(M(jnp.asarray(u_np), jnp.asarray(v_np))))
    plan = pi / pi.sum(axis=1, keepdims=True)
    return plan @ np.array(y)


if __name__ == "__main__":
    # Small shapes implied by the module: P1 support prototypes, P2 query
    # features, feature dim D.
    P1, P2, D = 8, 16, 32
    key = jax.random.PRNGKey(0)
    k1, k2 = jax.random.split(key)
    z_support = jax.random.normal(k1, (P1, D), dtype=jnp.float32)
    z_query = jax.random.normal(k2, (P2, D), dtype=jnp.float32)

    regularization = 0.1
    max_iter = 50
    stopping_criterion = 1e-3

    z_t, z_q = opta_forward(
        z_support, z_query,
        regularization=regularization,
        max_iter=max_iter,
        stopping_criterion=stopping_criterion,
    )
    jax.block_until_ready(z_t)

    ref = _opta_reference(
        z_support, z_query,
        eps=regularization, max_iter=max_iter, thresh=stopping_criterion,
    )
    np.testing.assert_allclose(np.array(z_t), ref, rtol=5e-4, atol=5e-4)
    assert z_q.shape == (P2, D)

    print("KERNEL_OK")
</pallas_src>

<mosaic_0001>
module attributes {stable_mosaic.version = 11 : i64} {
  func.func @_opta_kernel(%arg0: memref<8x32xf32, #tpu.memory_space<vmem>>, %arg1: memref<16x32xf32, #tpu.memory_space<vmem>>, %arg2: memref<8x32xf32, #tpu.memory_space<vmem>>) attributes {dimension_semantics = [], scalar_prefetch = 0 : i64, scratch_operands = 0 : i64, tpu.core_type = #tpu.core_type<tc>} {
    %c0 = arith.constant 0 : index
    %c0_0 = arith.constant 0 : index
    %0 = vector.load %arg0[%c0, %c0_0] : memref<8x32xf32, #tpu.memory_space<vmem>>, vector<8x32xf32>
    %c0_1 = arith.constant 0 : index
    %c0_2 = arith.constant 0 : index
    %1 = vector.load %arg1[%c0_1, %c0_2] : memref<16x32xf32, #tpu.memory_space<vmem>>, vector<16x32xf32>
    %2 = arith.mulf %0, %0 : vector<8x32xf32>
    %cst = arith.constant dense<0.000000e+00> : vector<8xf32>
    %3 = vector.multi_reduction <add>, %2, %cst [1] : vector<8x32xf32> to vector<8xf32>
    %4 = vector.shape_cast %3 : vector<8xf32> to vector<8x1xf32>
    %5 = arith.mulf %1, %1 : vector<16x32xf32>
    %cst_3 = arith.constant dense<0.000000e+00> : vector<16xf32>
    %6 = vector.multi_reduction <add>, %5, %cst_3 [1] : vector<16x32xf32> to vector<16xf32>
    %7 = vector.shape_cast %6 : vector<16xf32> to vector<16x1xf32>
    %cst_4 = arith.constant dense<0.000000e+00> : vector<8x16xf32>
    %8 = tpu.matmul %0, %1, %cst_4 {dimension_numbers = #tpu.dot_dimension_numbers<[1], [1], [0], [0], [0, 0, 1, 0], [], []>} : vector<8x32xf32>, vector<16x32xf32>, vector<8x16xf32> -> vector<8x16xf32>
    %9 = tpu.transpose %7, [1, 0] : vector<16x1xf32> -> vector<1x16xf32>
    %10 = vector.broadcast %4 : vector<8x1xf32> to vector<8x16xf32>
    %11 = vector.broadcast %9 : vector<1x16xf32> to vector<8x16xf32>
    %12 = arith.addf %10, %11 : vector<8x16xf32>
    %cst_5 = arith.constant 2.000000e+00 : f32
    %13 = vector.broadcast %cst_5 : f32 to vector<8x16xf32>
    %14 = arith.mulf %13, %8 : vector<8x16xf32>
    %15 = arith.subf %12, %14 : vector<8x16xf32>
    %cst_6 = arith.constant 0.000000e+00 : f32
    %16 = vector.broadcast %cst_6 : f32 to vector<8x16xf32>
    %17 = arith.maximumf %15, %16 : vector<8x16xf32>
    %18 = vector.shape_cast %17 : vector<8x16xf32> to vector<1x8x16xf32>
    %cst_7 = arith.constant dense<0xFF800000> : vector<1xf32>
    %19 = vector.multi_reduction <maximumf>, %18, %cst_7 [1, 2] : vector<1x8x16xf32> to vector<1xf32>
    %20 = vector.shape_cast %19 : vector<1xf32> to vector<1x1x1xf32>
    %21 = vector.extract %20[0, 0, 0] : f32 from vector<1x1x1xf32>
    %22 = vector.broadcast %21 : f32 to vector<8x16xf32>
    %23 = arith.divf %17, %22 : vector<8x16xf32>
    %cst_8 = arith.constant -1.000000e+01 : f32
    %24 = vector.broadcast %cst_8 : f32 to vector<8x16xf32>
    %25 = arith.mulf %23, %24 : vector<8x16xf32>
    %cst_9 = arith.constant 0.000000e+00 : f32
    %26 = vector.broadcast %cst_9 : f32 to vector<8x1xf32>
    %cst_10 = arith.constant 0.000000e+00 : f32
    %27 = vector.broadcast %cst_10 : f32 to vector<1x16xf32>
    %cst_11 = arith.constant 0.00999999977 : f32
    %cst_12 = arith.constant -2.07944155 : f32
    %cst_13 = arith.constant -2.77258849 : f32
    %c0_i32 = arith.constant 0 : i32
    %cst_14 = arith.constant 0x7F800000 : f32
    %28:4 = scf.while (%arg3 = %c0_i32, %arg4 = %26, %arg5 = %27, %arg6 = %cst_14) : (i32, vector<8x1xf32>, vector<1x16xf32>, f32) -> (i32, vector<8x1xf32>, vector<1x16xf32>, f32) {
      %c50_i32 = arith.constant 50 : i32
      %41 = arith.cmpi slt, %arg3, %c50_i32 : i32
      %42 = arith.cmpf oge, %arg6, %cst_11 : f32
      %43 = arith.andi %41, %42 : i1
      scf.condition(%43) %arg3, %arg4, %arg5, %arg6 : i32, vector<8x1xf32>, vector<1x16xf32>, f32
    } do {
    ^bb0(%arg3: i32, %arg4: vector<8x1xf32>, %arg5: vector<1x16xf32>, %arg6: f32):
      %41 = vector.broadcast %arg4 : vector<8x1xf32> to vector<8x16xf32>
      %42 = arith.addf %25, %41 : vector<8x16xf32>
      %43 = vector.broadcast %arg5 : vector<1x16xf32> to vector<8x16xf32>
      %44 = arith.addf %42, %43 : vector<8x16xf32>
      %cst_19 = arith.constant dense<0xFF800000> : vector<8xf32>
      %45 = vector.multi_reduction <maximumf>, %44, %cst_19 [1] : vector<8x16xf32> to vector<8xf32>
      %46 = vector.shape_cast %45 : vector<8xf32> to vector<8x1xf32>
      %47 = vector.broadcast %46 : vector<8x1xf32> to vector<8x16xf32>
      %48 = arith.subf %44, %47 : vector<8x16xf32>
      %49 = math.exp %48 : vector<8x16xf32>
      %cst_20 = arith.constant dense<0.000000e+00> : vector<8xf32>
      %50 = vector.multi_reduction <add>, %49, %cst_20 [1] : vector<8x16xf32> to vector<8xf32>
      %51 = vector.shape_cast %50 : vector<8xf32> to vector<8x1xf32>
      %52 = math.log %51 : vector<8x1xf32>
      %53 = arith.addf %46, %52 : vector<8x1xf32>
      %54 = vector.broadcast %cst_12 : f32 to vector<8x1xf32>
      %55 = arith.subf %54, %53 : vector<8x1xf32>
      %56 = arith.addf %55, %arg4 : vector<8x1xf32>
      %57 = vector.broadcast %56 : vector<8x1xf32> to vector<8x16xf32>
      %58 = arith.addf %25, %57 : vector<8x16xf32>
      %59 = vector.broadcast %arg5 : vector<1x16xf32> to vector<8x16xf32>
      %60 = arith.addf %58, %59 : vector<8x16xf32>
      %cst_21 = arith.constant dense<0xFF800000> : vector<16xf32>
      %61 = vector.multi_reduction <maximumf>, %60, %cst_21 [0] : vector<8x16xf32> to vector<16xf32>
      %62 = vector.shape_cast %61 : vector<16xf32> to vector<1x16xf32>
      %63 = vector.broadcast %62 : vector<1x16xf32> to vector<8x16xf32>
      %64 = arith.subf %60, %63 : vector<8x16xf32>
      %65 = math.exp %64 : vector<8x16xf32>
      %cst_22 = arith.constant dense<0.000000e+00> : vector<16xf32>
      %66 = vector.multi_reduction <add>, %65, %cst_22 [0] : vector<8x16xf32> to vector<16xf32>
      %67 = vector.shape_cast %66 : vector<16xf32> to vector<1x16xf32>
      %68 = math.log %67 : vector<1x16xf32>
      %69 = arith.addf %62, %68 : vector<1x16xf32>
      %70 = vector.broadcast %cst_13 : f32 to vector<1x16xf32>
      %71 = arith.subf %70, %69 : vector<1x16xf32>
      %72 = arith.addf %71, %arg5 : vector<1x16xf32>
      %73 = arith.subf %56, %arg4 : vector<8x1xf32>
      %74 = math.absf %73 : vector<8x1xf32>
      %75 = vector.shape_cast %74 : vector<8x1xf32> to vector<1x8x1xf32>
      %cst_23 = arith.constant dense<0.000000e+00> : vector<1xf32>
      %76 = vector.multi_reduction <add>, %75, %cst_23 [1, 2] : vector<1x8x1xf32> to vector<1xf32>
      %77 = vector.shape_cast %76 : vector<1xf32> to vector<1x1x1xf32>
      %78 = vector.extract %77[0, 0, 0] : f32 from vector<1x1x1xf32>
      %c1_i32 = arith.constant 1 : i32
      %79 = arith.addi %arg3, %c1_i32 : i32
      scf.yield %79, %56, %72, %78 : i32, vector<8x1xf32>, vector<1x16xf32>, f32
    }
    %29 = vector.broadcast %28#1 : vector<8x1xf32> to vector<8x16xf32>
    %30 = arith.addf %25, %29 : vector<8x16xf32>
    %31 = vector.broadcast %28#2 : vector<1x16xf32> to vector<8x16xf32>
    %32 = arith.addf %30, %31 : vector<8x16xf32>
    %33 = math.exp %32 : vector<8x16xf32>
    %cst_15 = arith.constant dense<0.000000e+00> : vector<8xf32>
    %34 = vector.multi_reduction <add>, %33, %cst_15 [1] : vector<8x16xf32> to vector<8xf32>
    %35 = vector.shape_cast %34 : vector<8xf32> to vector<8x1xf32>
    %36 = tpu.reciprocal %35 : vector<8x1xf32> -> vector<8x1xf32>
    %37 = vector.broadcast %36 : vector<8x1xf32> to vector<8x16xf32>
    %38 = arith.mulf %33, %37 : vector<8x16xf32>
    %cst_16 = arith.constant dense<0.000000e+00> : vector<8x32xf32>
    %39 = tpu.matmul %38, %1, %cst_16 {dimension_numbers = #tpu.dot_dimension_numbers<[1], [0], [0], [1], [0, 0, 1, 1], [], []>} : vector<8x16xf32>, vector<16x32xf32>, vector<8x32xf32> -> vector<8x32xf32>
    %c0_17 = arith.constant 0 : index
    %c0_18 = arith.constant 0 : index
    %40 = vector.load %arg2[%c0_17, %c0_18] : memref<8x32xf32, #tpu.memory_space<vmem>>, vector<8x32xf32>
    tpu.vector_store %arg2[%c0_17, %c0_18], %39 {strides = array<i32>} : memref<8x32xf32, #tpu.memory_space<vmem>>, vector<8x32xf32>,
    return
  }
}

</mosaic_0001>

<bundles_post_ra>
// kernel: tpu_custom_call.1
= control target key start
LH: loop header
LB: loop body
LE: loop exit
PB: predicated region body
PF: predicated region fallthrough
CT: control target
= control target key end

     0   :  { %7 = vsyncpa [#allocation3], 0  ;;  %s655_s0 = inlined_call_operand.hbm [shape: f32[8,32], index: 0, kind: input, shape index: {}]   ;;  %s656_s1 = inlined_call_operand.hbm [shape: f32[16,32], index: 1, kind: input, shape index: {}]   ;;  %s657_s2 = inlined_call_operand.hbm [shape: f32[8,32], index: 2, kind: output, shape index: {}]  }
   0x1   :  { %8 = vsyncpa [#allocation6], 0 }
   0x2   :  { %9 = vsyncpa [#allocation4], 0  ;;  %s543_s9 = smov [#allocation2]   ;;  %s544_s11 = smov [#allocation5]  }
   0x3   :  { %s16_s10 = sshll.u32 %s543_s9, 4  ;;  %s25_s12 = sshll.u32 %s544_s11, 4  ;;  %s17_s10 = int_to_ptr.vmem [resolvable:$true] %s16_s10  ;;  %s566_s12 = int_to_ptr.vmem [resolvable:$true] %s25_s12 }
   0x4   :  { %s447_s15 = scalar_lea.hbm %s655_s0, 128 }
   0x5   :  { %p448_p0 = scmp.ne.s32.totalorder %s655_s0, %s447_s15  ;;  %p451_p1 = scmp.lt.u32.totalorder %s447_s15, %s655_s0 }
   0x7   :  { %p453_p2 = pnand %p451_p1, %p448_p0 }
   0x9   :  { %456 = shalt.err (!%p453_p2)
}
   0xa   :  { %s457_s20 = scalar_lea.vmem %s17_s10, 128  ;;  %p462_p4 = scmp.lt.s32.totalorder %s17_s10, %s17_s10 }
   0xb   :  { %p458_p3 = scmp.ne.s32.totalorder %s17_s10, %s457_s20  ;;  %p463_p5 = scmp.lt.s32.totalorder %s457_s20, %s457_s20 }
   0xd   :  { %p464_p6 = por %p463_p5, %p462_p4 }
   0xf   :  { %p465_p7 = pnand %p464_p6, %p458_p3 }
  0x11   :  { %468 = shalt.err (!%p465_p7)
}
  0x12   :  { %19 = dma.hbm_to_vmem [thread:$0]  %s655_s0, 128, %s17_s10, [#allocation3]  }
  0x13   :  { %s469_s25 = scalar_lea.hbm %s656_s1, 256 }
  0x14   :  { %p470_p8 = scmp.ne.s32.totalorder %s656_s1, %s469_s25  ;;  %p473_p9 = scmp.lt.u32.totalorder %s469_s25, %s656_s1 }
  0x16   :  { %p475_p10 = pnand %p473_p9, %p470_p8 }
  0x18   :  { %478 = shalt.err (!%p475_p10)
}
  0x19   :  { %s479_s30 = scalar_lea.vmem %s566_s12, 256  ;;  %p484_p12 = scmp.lt.s32.totalorder %s566_s12, %s566_s12 }
  0x1a   :  { %p480_p11 = scmp.ne.s32.totalorder %s566_s12, %s479_s30  ;;  %p485_p13 = scmp.lt.s32.totalorder %s479_s30, %s479_s30 }
  0x1c   :  { %p486_p0 = por %p485_p13, %p484_p12 }
  0x1e   :  { %p487_p1 = pnand %p486_p0, %p480_p11 }
  0x20   :  { %490 = shalt.err (!%p487_p1)
}
  0x21   :  { %s545_s0 = smov 128   ;;  %s546_s3 = smov 8  }
  0x22   :  { %31 = dma.hbm_to_vmem [thread:$0]  %s656_s1, 256, %s566_s12, [#allocation6], %s545_s0, %s545_s0, %s546_s3  }
  0x23   :  { %525 = dma.done.wait [#allocation3], 128  }
  0x24   :  { %526 = vsyncadd [#allocation3], 4294967168 }
  0x25   :  { %527 = dma.done.wait [#allocation6], 256  }
  0x26   :  { %528 = vsyncadd [#allocation6], 4294967040  ;;  %v547_v0 = vmov 0.0|0.0   ;;  %vm548_vm0 = vmmov 0   ;;  %v549_v1 = vmov 0.0   ;;  %vm42_vm1 = vcmask 261120  }
  0x27   :  { %390 = vmatprep.subr.bf16.mxu0 %v547_v0  ;;  %380 = vmatprep.mubr.msk.f32.mxu0 %vm548_vm0, %v549_v1  ;;  %vm392_vm2 = vmpackc.low %vm42_vm1, %vm42_vm1  ;;  %v39_v2 = vld [vmem:[#allocation5] sm:$0xff]  ;;  %v40_v3 = vld [vmem:[#allocation5 + $0x8] sm:$0xff]  ;;  %v165_v16 = vlaneseq  ;;  %vm173_vm3 = vcmask 130048   ;;  %v612_v38 = vmov 0.0   ;;  %v614_v39 = vmov 0.0   ;;  %s616_s6 = smov 0  }
  0x28   :  { %v38_v4 = vld [vmem:[#allocation2] sm:$0xff]  ;;  %v46_v5 = vmul.f32 %v39_v2, %v39_v2  ;;  %v47_v6 = vmul.f32 %v40_v3, %v40_v3  ;;  %v602_v7 = vpack.c.bf16 %v40_v3, %v39_v2 }
  0x29   :  { %v41_v8 = vmul.f32 %v38_v4, %v38_v4  ;;  %v166_v17 = vshrl.u32 %v165_v16, 7 }
  0x2a   :  { %v48_v9 = vsel %vm42_vm1, %v46_v5, 0.0  ;;  %393 = vmatpush3.bf16.xpose.msk.msra.mxu0 %vm392_vm2, %v602_v7  ;;  %v51_v11 = vsel %vm42_vm1, %v47_v6, 0.0 }
  0x2b   :  { %v43_v10 = vsel %vm42_vm1, %v41_v8, 0.0  ;;  %49 = vadd.xlane.f32.xlu0 %v48_v9  ;;  %v167_v19 = vsub.s32 0, %v166_v17 }
  0x2c   :  { %44 = vadd.xlane.f32.xlu1 %v43_v10 }
  0x2f   :  { %52 = vadd.xlane.f32.xlu0 %v51_v11 }
  0x31   :  { %381 = vmatmul.mubr.msk.f32.vlgmr.msra.gmra.mrb[0].mxu0 %vm42_vm1, %v38_v4 }
  0xb8   :  { %v50_v12 = vpop.xlane.xlu0 %49 }
  0xb9   :  { %133 = vxpose.xlu1.b32.start [1/2] (short) (narrow) %v50_v12, 8  ;;  %v45_v18 = vpop.xlane.xlu1 %44 }
  0xbc   :  { %v53_v13 = vpop.xlane.xlu0 %52 }
  0xbd   :  { %134 = vxpose.xlu1.b32.end [2/2] (short) (narrow) %v53_v13, 8 }
 0x104   :  { %v129_v14 = vpop.f32.mrb[0].mxu0 }
 0x105   :  { %v382_v15 = vpop.f32.mrb[1].mxu0  ;;  %v170_v22 = vmul.f32 2.0, %v129_v14 }
 0x139   :  { %v149_v20 = vpop.trf.xlu1 }
 0x13a   :  { %v168_v21 = vrot.slane %v149_v20, %v167_v19 }
 0x13c   :  { %v169_v23 = vadd.f32 %v168_v21, %v45_v18 }
 0x13e   :  { %v171_v24 = vsub.f32 %v169_v23, %v170_v22 }
 0x140   :  { %v172_v25 = vmax.f32 %v171_v24, 0.0 }
 0x142   :  { %v174_v26 = vsel %vm173_vm3, %v172_v25, -inf }
 0x143   :  { %175 = vmax.xlane.f32.xlu0 %v174_v26 }
 0x1d0   :  { %v176_v27 = vpop.xlane.xlu0 %175 }
 0x1d1   :  { %v177_v28 = vrot.slane %v176_v27, 4 }
 0x1d3   :  { %v178_v29 = vmax.f32 %v176_v27, %v177_v28 }
 0x1d5   :  { %v179_v30 = vrot.slane %v178_v29, 2 }
 0x1d7   :  { %v180_v31 = vmax.f32 %v178_v29, %v179_v30 }
 0x1d9   :  { %v181_v32 = vrot.slane %v180_v31, 1 }
 0x1db   :  { %v182_v33 = vmax.f32 %v180_v31, %v181_v32 }
 0x1dd   :  { %397 = vpush %v182_v33 }
 0x20e   :  { %s398_s1 = spop %397 }
 0x20f   :  { %v184_v34 = vstv %s398_s1 }
 0x210   :  { %433 = vrcp.f32 %v184_v34 }
 0x21a   :  { %v434_v35 = vpop.eup %433 }
 0x21b   :  { %v186_v36 = vmul.f32 %v434_v35, %v172_v25 }
 0x21d   :  { %v610_v37 = vmul.f32 -10.0, %v186_v36 }
 0x21e LB: > { %vm241_vm4 = vcmask 7168   ;;  %s252_s6 = sadd.s32 1, %s541_s6   ;;  %s541_s6 = sphi %s616_s6, %s252_s6   ;;  %v537_v39 = vphi %v614_v39, %v659_v39   ;;  %v533_v38 = vphi %v612_v38, %v658_v38  }
 0x21f   : > { %v199_v40 = vadd.f32 %v537_v39, %v610_v37  ;;  %p193_p2 = scmp.lt.s32.totalorder %s252_s6, 50 }
 0x221   : > { %v200_v41 = vadd.f32 %v533_v38, %v199_v40 }
 0x223   : > { %v201_v42 = vsel %vm173_vm3, %v200_v41, -inf }
 0x224   : > { %202 = vmax.xlane.f32.xlu0 %v201_v42 }
 0x2b1   : > { %v203_v43 = vpop.xlane.xlu0 %202 }
 0x2b2   : > { %v204_v44 = vsub.f32 %v200_v41, %v203_v43 }
 0x2b4   : > { %v205_v45 = vmul.f32 1.442695, %v204_v44 }
 0x2b6   : > { %435 = vpow2.f32 %v205_v45 }
 0x2c0   : > { %v436_v46 = vpop.eup %435 }
 0x2c1   : > { %v207_v47 = vsel %vm173_vm3, %v436_v46, 0.0 }
 0x2c2   : > { %208 = vadd.xlane.f32.xlu0 %v207_v47 }
 0x34f   : > { %v209_v48 = vpop.xlane.xlu0 %208 }
 0x350   : > { %437 = vlog2.f32 %v209_v48 }
 0x35a   : > { %v438_v49 = vpop.eup %437 }
 0x35b   : > { %v211_v50 = vmul.f32 0.6931472, %v438_v49 }
 0x35d   : > { %v212_v51 = vadd.f32 %v211_v50, %v203_v43 }
 0x35f   : > { %v213_v52 = vsub.f32 -2.0794415, %v212_v51 }
 0x361   : > { %v214_v53 = vadd.f32 %v537_v39, %v213_v52  }
 0x363   : > { %v239_v54 = vsub.f32 %v214_v53, %v537_v39  ;;  %v215_v55 = vadd.f32 %v214_v53, %v610_v37  ;;  %v659_v39 = vmov %v214_v53 }
 0x365   : > { %v240_v56 = vand.u32 2147483647, %v239_v54  ;;  %v216_v57 = vadd.f32 %v533_v38, %v215_v55 }
 0x367   : > { %v242_v58 = vsel %vm241_vm4, %v240_v56, 0.0  ;;  %v217_v59 = vsel %vm173_vm3, %v216_v57, -inf }
 0x368   : > { %243 = vadd.xlane.f32.xlu1 %v242_v58  ;;  %v218_v60 = vrot.slane %v217_v59, 4 }
 0x36a   : > { %v219_v61 = vmax.f32 %v217_v59, %v218_v60 }
 0x36c   : > { %v220_v62 = vrot.slane %v219_v61, 2 }
 0x36e   : > { %v221_v63 = vmax.f32 %v219_v61, %v220_v62 }
 0x370   : > { %v222_v2 = vrot.slane %v221_v63, 1 }
 0x372   : > { %v223_v3 = vmax.f32 %v221_v63, %v222_v2 }
 0x374   : > { %v224_v4 = vsub.f32 %v216_v57, %v223_v3 }
 0x376   : > { %v225_v5 = vmul.f32 1.442695, %v224_v4 }
 0x378   : > { %439 = vpow2.f32 %v225_v5 }
 0x382   : > { %v440_v6 = vpop.eup %439 }
 0x383   : > { %v227_v8 = vsel %vm173_vm3, %v440_v6, 0.0 }
 0x384   : > { %v228_v9 = vrot.slane %v227_v8, 4 }
 0x386   : > { %v229_v10 = vadd.f32 %v228_v9, %v227_v8 }
 0x388   : > { %v230_v11 = vrot.slane %v229_v10, 2 }
 0x38a   : > { %v231_v12 = vadd.f32 %v230_v11, %v229_v10 }
 0x38c   : > { %v232_v13 = vrot.slane %v231_v12, 1 }
 0x38e   : > { %v233_v14 = vadd.f32 %v232_v13, %v231_v12 }
 0x390   : > { %441 = vlog2.f32 %v233_v14 }
 0x39a   : > { %v442_v15 = vpop.eup %441 }
 0x39b   : > { %v235_v16 = vmul.f32 0.6931472, %v442_v15 }
 0x39d   : > { %v236_v17 = vadd.f32 %v235_v16, %v223_v3 }
 0x39f   : > { %v237_v18 = vsub.f32 -2.7725885, %v236_v17 }
 0x3a1   : > { %v238_v19 = vadd.f32 %v533_v38, %v237_v18  }
 0x3a3   : > { %v658_v38 = vmov %v238_v19 }
 0x3f5   : > { %v244_v20 = vpop.xlane.xlu1 %243 }
 0x3f6   : > { %v245_v21 = vrot.slane %v244_v20, 4 }
 0x3f8   : > { %v246_v22 = vadd.f32 %v245_v21, %v244_v20 }
 0x3fa   : > { %v247_v23 = vrot.slane %v246_v22, 2 }
 0x3fc   : > { %v248_v24 = vadd.f32 %v247_v23, %v246_v22 }
 0x3fe   : > { %v249_v25 = vrot.slane %v248_v24, 1 }
 0x400   : > { %v250_v26 = vadd.f32 %v249_v25, %v248_v24 }
 0x402   : > { %399 = vpush %v250_v26 }
 0x433   : > { %s400_s7 = spop %399 }
 0x434   : > { %p194_p3 = scmp.ge.f32.partialorder %s400_s7, 0.01 }
 0x436   : > { %p195_p4 = pnand %p194_p3, %p193_p2 }
 0x437   :  { %v254_v27 = vadd.f32 (%p195_p4), %v238_v19, %v215_v55  ;;  %394 = vmatprep.subr.bf16.mxu1 (%p195_p4), %v547_v0  ;;  %387 = vmatprep.mubr.msk.f32.mxu1 (%p195_p4), %vm548_vm0, %v549_v1  ;;  %s550_s8 = smov (%p195_p4), [#allocation7]  }
 0x438   :  { %198 = sbr.rel (!%p195_p4) target bundleno = 542 (0x21e), region = 43  ;;  %396 = vmatpush3.bf16.msra.mxu1 (%p195_p4), %v602_v7  ;;  %s342_s9 = sshll.u32 (%p195_p4), %s550_s8, 4  ;;  %s343_s9 = int_to_ptr.vmem [resolvable:$true] %s342_s9 }
 0x439   :  { %v255_v28 = vmul.f32 (%p195_p4), 1.442695, %v254_v27  ;;  %s491_s10 = scalar_lea.vmem (%p195_p4), %s343_s9, 128  ;;  %p496_p6 = scmp.lt.s32.totalorder (%p195_p4), %s343_s9, %s343_s9 }
 0x43a   :  { %p492_p5 = scmp.ne.s32.totalorder (%p195_p4), %s343_s9, %s491_s10  ;;  %p497_p7 = scmp.lt.s32.totalorder (%p195_p4), %s491_s10, %s491_s10 }
 0x43b   :  { %443 = vpow2.f32 (%p195_p4), %v255_v28 }
 0x43c   :  { %p498_p8 = por (%p195_p4), %p497_p7, %p496_p6 }
 0x43e   :  { %p499_p9 = pnand (%p195_p4), %p498_p8, %p492_p5 }
 0x445   :  { %v444_v29 = vpop.eup %443 }
 0x446   :  { %v257_v30 = vsel %vm173_vm3, %v444_v29, 0.0 }
 0x447   :  { %258 = vadd.xlane.f32.xlu0 %v257_v30 }
 0x4d4   :  { %v259_v31 = vpop.xlane.xlu0 %258 }
 0x4d5   :  { %445 = vrcp.f32 %v259_v31 }
 0x4df   :  { %v446_v32 = vpop.eup %445 }
 0x4e0   :  { %v261_v33 = vmul.f32 %v446_v32, %v444_v29 }
 0x4e2   :  { %388 = vmatmul.mubr.msk.f32.vlgmr.msra.gmra.mrb[0].mxu1 %vm173_vm3, %v261_v33 }
 0x5b5   :  { %v331_v0 = vpop.f32.mrb[0].mxu1 }
 0x5b6   :  { %335 = vst.msk [vmem:[#allocation7] sm:$0xff] %vm42_vm1, %v331_v0  ;;  %v389_v1 = vpop.f32.mrb[1].mxu1 }
 0x5b7   :  { %502 = shalt.err (!%p499_p9)
}
 0x5b8   :  { %s503_s13 = scalar_lea.hbm %s657_s2, 128 }
 0x5b9   :  { %p504_p10 = scmp.ne.s32.totalorder %s657_s2, %s503_s13  ;;  %p507_p11 = scmp.lt.u32.totalorder %s503_s13, %s657_s2 }
 0x5bb   :  { %p509_p12 = pnand %p507_p11, %p504_p10 }
 0x5bd   :  { %512 = shalt.err (!%p509_p12)
}
 0x5be   :  { %345 = dma.vmem_to_hbm [thread:$0]  %s343_s9, 128, %s657_s2, [#allocation4]  }
 0x5bf   :  { %529 = dma.done.wait [#allocation4], 128  }
 0x5c0   :  { %530 = vsyncadd [#allocation4], 4294967168 }
 0x5c1   :  { %349 = vsyncpa [#allocation3], 1 }
 0x5c2   :  { %350 = vsyncpa [#allocation6], 1 }
 0x5c3   :  { %351 = vsyncpa [#allocation4], 1 }

</bundles_post_ra>
